<compile_context>
chip_gen: v7x
topology: tpu7x:2x2x1
jax: 0.10.0
libtpu: 0.0.40
codegen_flags: <defaults>
</compile_context>

<pallas_src>
import functools

import jax
import jax.numpy as jnp
from jax.experimental import pallas as pl
from jax.experimental.pallas import tpu as pltpu

H = 256            # hidden size (fixed by the PyTorch module)
N_LAYERS = 6       # fc1..fc5 + out
OUT_PAD = 128      # lane-dense padded output width (requires action_dim <= 128)
X_PAD = 128        # lane-dense padded input width   (requires state_dim  <= 128)
TILE_B_MAX = 512   # max batch rows per grid step (large-batch regime)


def relu_actor_kernel(x_ref, w_ref, b_ref, o_ref):
    """x_ref: (tile_b, X_PAD) bf16   w_ref: (6, H, H) bf16   b_ref: (6, 1, H) f32
       o_ref: (tile_b, OUT_PAD) f32.  Whole forward pass on one VMEM-resident tile."""
    in_dim = x_ref.shape[-1]
    # fc1: bf16 input tile x the first in_dim rows of the padded weight (rest are zero).
    acc = jnp.dot(x_ref[...], w_ref[0, :in_dim, :], preferred_element_type=jnp.float32)
    h = jnp.maximum(acc + b_ref[0], 0.0)                       # f32 elementwise (VPU)
    # fc2..fc5: bf16 MXU matmul, f32 accumulate, f32 bias/ReLU.
    for i in range(1, N_LAYERS - 1):                           # static unroll
        acc = jnp.dot(h.astype(jnp.bfloat16), w_ref[i],
                      preferred_element_type=jnp.float32)
        h = jnp.maximum(acc + b_ref[i], 0.0)
    # out: Linear + tanh (EUP); only the first OUT_PAD lane-dense columns are real.
    y = jnp.dot(h.astype(jnp.bfloat16), w_ref[N_LAYERS - 1, :, :OUT_PAD],
                preferred_element_type=jnp.float32) + b_ref[N_LAYERS - 1, :, :OUT_PAD]
    o_ref[...] = jnp.tanh(y).astype(o_ref.dtype)


def _round_up(v, m):
    return -(-v // m) * m


def _choose_tiling(batch, tile_b_max=TILE_B_MAX):
    """Returns (padded_batch, tile_b); tile_b is a multiple of 16 (bf16 sublane pack)."""
    rb = _round_up(batch, 16)
    if rb <= 128:
        return rb, rb                               # tiny batch: one small tile
    tile_b = min(tile_b_max, rb)
    # v7x megacore: make sure there are at least 2 grid steps when batch > 128.
    tile_b = min(tile_b, _round_up(_round_up(rb, 2) // 2, 16))
    padded_b = pl.cdiv(rb, tile_b) * tile_b
    return padded_b, tile_b


def relu_actor_forward(x, w_packed, b_packed, action_dim):
    """x: (batch, state_dim) f32. Returns (batch, action_dim) f32."""
    batch, state_dim = x.shape
    assert state_dim <= X_PAD, f"state_dim={state_dim} > {X_PAD} not supported"
    assert action_dim <= OUT_PAD, f"action_dim={action_dim} > {OUT_PAD} not supported"

    padded_b, tile_b = _choose_tiling(batch)
    # Zero-pad batch/features and cast the streamed input to bf16 once in the wrapper.
    x_pad = jnp.pad(x, ((0, padded_b - batch), (0, X_PAD - state_dim))
                    ).astype(jnp.bfloat16)

    out = pl.pallas_call(
        relu_actor_kernel,
        out_shape=jax.ShapeDtypeStruct((padded_b, OUT_PAD), jnp.float32),
        grid=(padded_b // tile_b,),
        in_specs=[
            pl.BlockSpec((tile_b, X_PAD), lambda i: (i, 0)),         # bf16 batch tile of x
            pl.BlockSpec((N_LAYERS, H, H), lambda i: (0, 0, 0)),     # all weights, resident
            pl.BlockSpec((N_LAYERS, 1, H), lambda i: (0, 0, 0)),     # all biases, resident
        ],
        out_specs=pl.BlockSpec((tile_b, OUT_PAD), lambda i: (i, 0)),
        compiler_params=pltpu.CompilerParams(
            dimension_semantics=("parallel",)),                      # batch tiles -> v7x 2 TCs
    )(x_pad, w_packed, b_packed)
    return out[:batch, :action_dim]


def make_params(key, state_dim, action_dim, h_size=H):
    """Packed parameters matching the PyTorch init:
       orthogonal_(gain=calculate_gain('relu')) weights, zero biases."""
    gain = float(jnp.sqrt(2.0))
    dims = [(state_dim, h_size), (h_size, h_size), (h_size, h_size),
            (h_size, h_size), (h_size, h_size), (h_size, action_dim)]
    w_packed = jnp.zeros((N_LAYERS, h_size, h_size), jnp.float32)
    b_packed = jnp.zeros((N_LAYERS, 1, h_size), jnp.float32)        # constant_(0)
    for i, (din, dout) in enumerate(dims):
        key, sub = jax.random.split(key)
        # PyTorch Linear weight is (out, in); store its transpose as (in, out), zero-padded.
        w_out_in = jax.nn.initializers.orthogonal(scale=gain)(sub, (dout, din), jnp.float32)
        w_packed = w_packed.at[i, :din, :dout].set(jnp.transpose(w_out_in))
    return w_packed.astype(jnp.bfloat16), b_packed


def reference_forward(x, w_packed, b_packed, action_dim):
    """Pure-JAX reference mirroring the kernel's dtypes (bf16 matmul, f32 accumulate)."""
    batch, state_dim = x.shape
    h_in = jnp.pad(x, ((0, 0), (0, X_PAD - state_dim))).astype(jnp.bfloat16)
    acc = jnp.dot(h_in, w_packed[0, :X_PAD, :], preferred_element_type=jnp.float32)
    h = jnp.maximum(acc + b_packed[0], 0.0)
    for i in range(1, N_LAYERS - 1):
        acc = jnp.dot(h.astype(jnp.bfloat16), w_packed[i],
                      preferred_element_type=jnp.float32)
        h = jnp.maximum(acc + b_packed[i], 0.0)
    y = jnp.dot(h.astype(jnp.bfloat16), w_packed[N_LAYERS - 1, :, :OUT_PAD],
                preferred_element_type=jnp.float32) + b_packed[N_LAYERS - 1, :, :OUT_PAD]
    return jnp.tanh(y)[:, :action_dim]


if __name__ == "__main__":
    key = jax.random.PRNGKey(0)
    state_dim, action_dim = 16, 8
    key, kx, kx2, kp = jax.random.split(key, 4)
    w_packed, b_packed = make_params(kp, state_dim, action_dim)

    fwd = jax.jit(functools.partial(relu_actor_forward, action_dim=action_dim))

    # Small-batch (inference/latency) path: single 16-row tile, grid=(1,).
    x_small = jax.random.normal(kx, (8, state_dim), jnp.float32)
    out_small = jax.block_until_ready(fwd(x_small, w_packed, b_packed))
    ref_small = reference_forward(x_small, w_packed, b_packed, action_dim)
    assert out_small.shape == (8, action_dim)
    assert bool(jnp.all(jnp.abs(out_small) <= 1.0 + 1e-6)), "tanh range violated"
    assert jnp.allclose(out_small, ref_small, atol=1e-3, rtol=1e-3), "small-batch mismatch"

    # Larger-batch path: exercises the multi-tile grid (>=2 steps, megacore-friendly).
    x_big = jax.random.normal(kx2, (300, state_dim), jnp.float32)
    out_big = jax.block_until_ready(fwd(x_big, w_packed, b_packed))
    ref_big = reference_forward(x_big, w_packed, b_packed, action_dim)
    assert out_big.shape == (300, action_dim)
    assert jnp.allclose(out_big, ref_big, atol=1e-3, rtol=1e-3), "multi-tile mismatch"

    print("KERNEL_OK")
</pallas_src>

<mosaic_0001>
module attributes {stable_mosaic.version = 11 : i64} {
  func.func @relu_actor_kernel(%arg0: i32, %arg1: memref<16x128xbf16, #tpu.memory_space<vmem>>, %arg2: memref<6x256x256xbf16, #tpu.memory_space<vmem>>, %arg3: memref<6x1x256xf32, #tpu.memory_space<vmem>>, %arg4: memref<16x128xf32, #tpu.memory_space<vmem>>) attributes {dimension_semantics = [#tpu.dimension_semantics<parallel>], iteration_bounds = array<i64: 1>, scalar_prefetch = 0 : i64, scratch_operands = 0 : i64, tpu.core_type = #tpu.core_type<tc>, window_params = [{transform_indices = @transform_0, window_bounds = array<i64: 16, 128>}, {pipeline_mode = #tpu.pipeline_mode<synchronous>, transform_indices = @transform_1, window_bounds = array<i64: 6, 256, 256>}, {pipeline_mode = #tpu.pipeline_mode<synchronous>, transform_indices = @transform_2, window_bounds = array<i64: 6, 1, 256>}, {transform_indices = @transform_3, window_bounds = array<i64: 16, 128>}]} {
    %c0 = arith.constant 0 : index
    %c0_0 = arith.constant 0 : index
    %0 = vector.load %arg1[%c0, %c0_0] : memref<16x128xbf16, #tpu.memory_space<vmem>>, vector<16x128xbf16>
    %c0_1 = arith.constant 0 : index
    %c0_2 = arith.constant 0 : index
    %c0_3 = arith.constant 0 : index
    %1 = vector.load %arg2[%c0_1, %c0_2, %c0_3] : memref<6x256x256xbf16, #tpu.memory_space<vmem>>, vector<1x128x256xbf16>
    %2 = vector.shape_cast %1 : vector<1x128x256xbf16> to vector<128x256xbf16>
    %cst = arith.constant dense<0.000000e+00> : vector<16x256xf32>
    %3 = tpu.matmul %0, %2, %cst {dimension_numbers = #tpu.dot_dimension_numbers<[1], [0], [0], [1], [0, 0, 1, 1], [], []>} : vector<16x128xbf16>, vector<128x256xbf16>, vector<16x256xf32> -> vector<16x256xf32>
    %c0_4 = arith.constant 0 : index
    %c0_5 = arith.constant 0 : index
    %c0_6 = arith.constant 0 : index
    %4 = vector.load %arg3[%c0_4, %c0_5, %c0_6] : memref<6x1x256xf32, #tpu.memory_space<vmem>>, vector<1x1x256xf32>
    %5 = vector.shape_cast %4 : vector<1x1x256xf32> to vector<1x256xf32>
    %6 = vector.broadcast %5 : vector<1x256xf32> to vector<16x256xf32>
    %7 = arith.addf %3, %6 : vector<16x256xf32>
    %cst_7 = arith.constant 0.000000e+00 : f32
    %8 = vector.broadcast %cst_7 : f32 to vector<16x256xf32>
    %9 = arith.maximumf %7, %8 : vector<16x256xf32>
    %10 = arith.truncf %9 : vector<16x256xf32> to vector<16x256xbf16>
    %c1 = arith.constant 1 : index
    %c0_8 = arith.constant 0 : index
    %c0_9 = arith.constant 0 : index
    %11 = vector.load %arg2[%c1, %c0_8, %c0_9] : memref<6x256x256xbf16, #tpu.memory_space<vmem>>, vector<1x256x256xbf16>
    %12 = vector.shape_cast %11 : vector<1x256x256xbf16> to vector<256x256xbf16>
    %cst_10 = arith.constant dense<0.000000e+00> : vector<16x256xf32>
    %13 = tpu.matmul %10, %12, %cst_10 {dimension_numbers = #tpu.dot_dimension_numbers<[1], [0], [0], [1], [0, 0, 1, 1], [], []>} : vector<16x256xbf16>, vector<256x256xbf16>, vector<16x256xf32> -> vector<16x256xf32>
    %c1_11 = arith.constant 1 : index
    %c0_12 = arith.constant 0 : index
    %c0_13 = arith.constant 0 : index
    %14 = vector.load %arg3[%c1_11, %c0_12, %c0_13] : memref<6x1x256xf32, #tpu.memory_space<vmem>>, vector<1x1x256xf32>
    %15 = vector.shape_cast %14 : vector<1x1x256xf32> to vector<1x256xf32>
    %16 = vector.broadcast %15 : vector<1x256xf32> to vector<16x256xf32>
    %17 = arith.addf %13, %16 : vector<16x256xf32>
    %cst_14 = arith.constant 0.000000e+00 : f32
    %18 = vector.broadcast %cst_14 : f32 to vector<16x256xf32>
    %19 = arith.maximumf %17, %18 : vector<16x256xf32>
    %20 = arith.truncf %19 : vector<16x256xf32> to vector<16x256xbf16>
    %c2 = arith.constant 2 : index
    %c0_15 = arith.constant 0 : index
    %c0_16 = arith.constant 0 : index
    %21 = vector.load %arg2[%c2, %c0_15, %c0_16] : memref<6x256x256xbf16, #tpu.memory_space<vmem>>, vector<1x256x256xbf16>
    %22 = vector.shape_cast %21 : vector<1x256x256xbf16> to vector<256x256xbf16>
    %cst_17 = arith.constant dense<0.000000e+00> : vector<16x256xf32>
    %23 = tpu.matmul %20, %22, %cst_17 {dimension_numbers = #tpu.dot_dimension_numbers<[1], [0], [0], [1], [0, 0, 1, 1], [], []>} : vector<16x256xbf16>, vector<256x256xbf16>, vector<16x256xf32> -> vector<16x256xf32>
    %c2_18 = arith.constant 2 : index
    %c0_19 = arith.constant 0 : index
    %c0_20 = arith.constant 0 : index
    %24 = vector.load %arg3[%c2_18, %c0_19, %c0_20] : memref<6x1x256xf32, #tpu.memory_space<vmem>>, vector<1x1x256xf32>
    %25 = vector.shape_cast %24 : vector<1x1x256xf32> to vector<1x256xf32>
    %26 = vector.broadcast %25 : vector<1x256xf32> to vector<16x256xf32>
    %27 = arith.addf %23, %26 : vector<16x256xf32>
    %cst_21 = arith.constant 0.000000e+00 : f32
    %28 = vector.broadcast %cst_21 : f32 to vector<16x256xf32>
    %29 = arith.maximumf %27, %28 : vector<16x256xf32>
    %30 = arith.truncf %29 : vector<16x256xf32> to vector<16x256xbf16>
    %c3 = arith.constant 3 : index
    %c0_22 = arith.constant 0 : index
    %c0_23 = arith.constant 0 : index
    %31 = vector.load %arg2[%c3, %c0_22, %c0_23] : memref<6x256x256xbf16, #tpu.memory_space<vmem>>, vector<1x256x256xbf16>
    %32 = vector.shape_cast %31 : vector<1x256x256xbf16> to vector<256x256xbf16>
    %cst_24 = arith.constant dense<0.000000e+00> : vector<16x256xf32>
    %33 = tpu.matmul %30, %32, %cst_24 {dimension_numbers = #tpu.dot_dimension_numbers<[1], [0], [0], [1], [0, 0, 1, 1], [], []>} : vector<16x256xbf16>, vector<256x256xbf16>, vector<16x256xf32> -> vector<16x256xf32>
    %c3_25 = arith.constant 3 : index
    %c0_26 = arith.constant 0 : index
    %c0_27 = arith.constant 0 : index
    %34 = vector.load %arg3[%c3_25, %c0_26, %c0_27] : memref<6x1x256xf32, #tpu.memory_space<vmem>>, vector<1x1x256xf32>
    %35 = vector.shape_cast %34 : vector<1x1x256xf32> to vector<1x256xf32>
    %36 = vector.broadcast %35 : vector<1x256xf32> to vector<16x256xf32>
    %37 = arith.addf %33, %36 : vector<16x256xf32>
    %cst_28 = arith.constant 0.000000e+00 : f32
    %38 = vector.broadcast %cst_28 : f32 to vector<16x256xf32>
    %39 = arith.maximumf %37, %38 : vector<16x256xf32>
    %40 = arith.truncf %39 : vector<16x256xf32> to vector<16x256xbf16>
    %c4 = arith.constant 4 : index
    %c0_29 = arith.constant 0 : index
    %c0_30 = arith.constant 0 : index
    %41 = vector.load %arg2[%c4, %c0_29, %c0_30] : memref<6x256x256xbf16, #tpu.memory_space<vmem>>, vector<1x256x256xbf16>
    %42 = vector.shape_cast %41 : vector<1x256x256xbf16> to vector<256x256xbf16>
    %cst_31 = arith.constant dense<0.000000e+00> : vector<16x256xf32>
    %43 = tpu.matmul %40, %42, %cst_31 {dimension_numbers = #tpu.dot_dimension_numbers<[1], [0], [0], [1], [0, 0, 1, 1], [], []>} : vector<16x256xbf16>, vector<256x256xbf16>, vector<16x256xf32> -> vector<16x256xf32>
    %c4_32 = arith.constant 4 : index
    %c0_33 = arith.constant 0 : index
    %c0_34 = arith.constant 0 : index
    %44 = vector.load %arg3[%c4_32, %c0_33, %c0_34] : memref<6x1x256xf32, #tpu.memory_space<vmem>>, vector<1x1x256xf32>
    %45 = vector.shape_cast %44 : vector<1x1x256xf32> to vector<1x256xf32>
    %46 = vector.broadcast %45 : vector<1x256xf32> to vector<16x256xf32>
    %47 = arith.addf %43, %46 : vector<16x256xf32>
    %cst_35 = arith.constant 0.000000e+00 : f32
    %48 = vector.broadcast %cst_35 : f32 to vector<16x256xf32>
    %49 = arith.maximumf %47, %48 : vector<16x256xf32>
    %50 = arith.truncf %49 : vector<16x256xf32> to vector<16x256xbf16>
    %c5 = arith.constant 5 : index
    %c0_36 = arith.constant 0 : index
    %c0_37 = arith.constant 0 : index
    %51 = vector.load %arg2[%c5, %c0_36, %c0_37] : memref<6x256x256xbf16, #tpu.memory_space<vmem>>, vector<1x256x128xbf16>
    %52 = vector.shape_cast %51 : vector<1x256x128xbf16> to vector<256x128xbf16>
    %cst_38 = arith.constant dense<0.000000e+00> : vector<16x128xf32>
    %53 = tpu.matmul %50, %52, %cst_38 {dimension_numbers = #tpu.dot_dimension_numbers<[1], [0], [0], [1], [0, 0, 1, 1], [], []>} : vector<16x256xbf16>, vector<256x128xbf16>, vector<16x128xf32> -> vector<16x128xf32>
    %c5_39 = arith.constant 5 : index
    %c0_40 = arith.constant 0 : index
    %c0_41 = arith.constant 0 : index
    %54 = vector.load %arg3[%c5_39, %c0_40, %c0_41] : memref<6x1x256xf32, #tpu.memory_space<vmem>>, vector<1x1x128xf32>
    %55 = vector.shape_cast %54 : vector<1x1x128xf32> to vector<1x128xf32>
    %56 = vector.broadcast %55 : vector<1x128xf32> to vector<16x128xf32>
    %57 = arith.addf %53, %56 : vector<16x128xf32>
    %58 = math.tanh %57 : vector<16x128xf32>
    %c0_42 = arith.constant 0 : index
    %c0_43 = arith.constant 0 : index
    %59 = vector.load %arg4[%c0_42, %c0_43] : memref<16x128xf32, #tpu.memory_space<vmem>>, vector<16x128xf32>
    tpu.vector_store %arg4[%c0_42, %c0_43], %58 {strides = array<i32>} : memref<16x128xf32, #tpu.memory_space<vmem>>, vector<16x128xf32>,
    return
  }
  func.func @transform_0(%arg0: i32) -> (i32, i32) {
    %c0_i32 = arith.constant 0 : i32
    %c0_i32_0 = arith.constant 0 : i32
    return %arg0, %c0_i32 : i32, i32
  }
  func.func @transform_1(%arg0: i32) -> (i32, i32, i32) {
    %c0_i32 = arith.constant 0 : i32
    %c0_i32_0 = arith.constant 0 : i32
    %c0_i32_1 = arith.constant 0 : i32
    %c0_i32_2 = arith.constant 0 : i32
    return %c0_i32, %c0_i32_0, %c0_i32_1 : i32, i32, i32
  }
  func.func @transform_2(%arg0: i32) -> (i32, i32, i32) {
    %c0_i32 = arith.constant 0 : i32
    %c0_i32_0 = arith.constant 0 : i32
    %c0_i32_1 = arith.constant 0 : i32
    %c0_i32_2 = arith.constant 0 : i32
    return %c0_i32, %c0_i32_0, %c0_i32_1 : i32, i32, i32
  }
  func.func @transform_3(%arg0: i32) -> (i32, i32) {
    %c0_i32 = arith.constant 0 : i32
    %c0_i32_0 = arith.constant 0 : i32
    return %arg0, %c0_i32 : i32, i32
  }
}

</mosaic_0001>

<bundles_post_ra>
// kernel: relu_actor_forward.1
= control target key start
LH: loop header
LB: loop body
LE: loop exit
PB: predicated region body
PF: predicated region fallthrough
CT: control target
= control target key end

     0   :  { %8 = vsyncpa [#allocation3], 0  ;;  %s1855_s12 = smov [#allocation2]   ;;  %s1932_s0 = inlined_call_operand.vmem [shape: bf16[16,128], index: 0, kind: input, shape index: {}]   ;;  %s1933_s1 = inlined_call_operand.hbm [shape: bf16[6,256,256], index: 1, kind: input, shape index: {}]   ;;  %s1934_s2 = inlined_call_operand.vmem [shape: f32[6,1,256], index: 2, kind: input, shape index: {}]   ;;  %s1935_s3 = inlined_call_operand.vmem [shape: f32[16,128], index: 3, kind: output, shape index: {}]  }
   0x1   :  { %s16_s13 = sshll.u32 %s1855_s12, 4  ;;  %s1831_s16 = scalar_lea.hbm %s1933_s1, 24576  ;;  %s17_s13 = int_to_ptr.vmem [resolvable:$true] %s16_s13 }
   0x2   :  { %p1832_p0 = scmp.ne.s32.totalorder %s1933_s1, %s1831_s16  ;;  %p1835_p1 = scmp.lt.u32.totalorder %s1831_s16, %s1933_s1 }
   0x4   :  { %p1837_p2 = pnand %p1835_p1, %p1832_p0 }
   0x6   :  { %1840 = shalt.err (!%p1837_p2)
}
   0x7   :  { %s1841_s21 = scalar_lea.vmem %s17_s13, 24576  ;;  %p1846_p4 = scmp.lt.s32.totalorder %s17_s13, %s17_s13 }
   0x8   :  { %p1842_p3 = scmp.ne.s32.totalorder %s17_s13, %s1841_s21  ;;  %p1847_p5 = scmp.lt.s32.totalorder %s1841_s21, %s1841_s21 }
   0xa   :  { %p1848_p6 = por %p1847_p5, %p1846_p4 }
   0xc   :  { %p1849_p7 = pnand %p1848_p6, %p1842_p3 }
   0xe   :  { %1852 = shalt.err (!%p1849_p7)
}
   0xf   :  { %s1856_s22 = smov 128   ;;  %s1857_s23 = smov 8  }
  0x10   :  { %22 = dma.hbm_to_vmem [thread:$0]  %s1933_s1, 24576, %s17_s13, [#allocation3], %s1856_s22, %s1856_s22, %s1857_s23  }
  0x11   :  { %1853 = dma.done.wait [#allocation3], 24576  }
  0x12   :  { %1854 = vsyncadd [#allocation3], 4294942720  ;;  %v1858_v0 = vmov 0   ;;  %v1594_v1 = vld [vmem:[#allocation2 + $0x4] ss:$8 sps:$4 sm:$0xff]  }
  0x13   :  { %177 = vmatprep.mubr.bf16.mxu0 %v1858_v0  ;;  %v1596_v2 = vld [vmem:[#allocation2] ss:$8 sps:$4 sm:$0xff]   ;;  %145 = vmatprep.subr.bf16.mxu0 %v1594_v1  ;;  %v1597_v3 = vld [vmem:[#allocation2 + $0x14] ss:$8 sps:$4 sm:$0xff]   ;;  %v1599_v4 = vld [vmem:[#allocation2 + $0x10] ss:$8 sps:$4 sm:$0xff]  }
  0x14   :  { %146 = vmatpush1.bf16.msra.mxu0 %v1596_v2  ;;  %v1600_v5 = vld [vmem:[#allocation2 + $0x24] ss:$8 sps:$4 sm:$0xff]   ;;  %v1602_v6 = vld [vmem:[#allocation2 + $0x20] ss:$8 sps:$4 sm:$0xff]   ;;  %v1603_v7 = vld [vmem:[#allocation2 + $0x34] ss:$8 sps:$4 sm:$0xff]  }
  0x15   :  { %147 = vmatprep.subr.bf16.mxu0 %v1597_v3  ;;  %v1605_v8 = vld [vmem:[#allocation2 + $0x30] ss:$8 sps:$4 sm:$0xff]   ;;  %v1606_v9 = vld [vmem:[#allocation2 + $0x44] ss:$8 sps:$4 sm:$0xff]   ;;  %v1621_v11 = vld [vmem:[#allocation2 + $0x100] ss:$8 sps:$4 sm:$0xff]  }
  0x16   :  { %v1619_v10 = vld [vmem:[#allocation2 + $0x104] ss:$8 sps:$4 sm:$0xff]   ;;  %v1622_v12 = vld [vmem:[#allocation2 + $0x114] ss:$8 sps:$4 sm:$0xff]   ;;  %v1608_v13 = vld [vmem:[#allocation2 + $0x40] ss:$8 sps:$4 sm:$0xff]  }
  0x17   :  { %400 = vmatprep.subr.bf16.mxu1 %v1619_v10  ;;  %v1624_v14 = vld [vmem:[#allocation2 + $0x110] ss:$8 sps:$4 sm:$0xff]   ;;  %v1609_v15 = vld [vmem:[#allocation2 + $0x54] ss:$8 sps:$4 sm:$0xff]   ;;  %v1625_v16 = vld [vmem:[#allocation2 + $0x124] ss:$8 sps:$4 sm:$0xff]  }
  0x18   :  { %148 = vmatpush1.bf16.msra.mxu0 %v1599_v4  ;;  %401 = vmatpush1.bf16.msra.mxu1 %v1621_v11  ;;  %v1611_v17 = vld [vmem:[#allocation2 + $0x50] ss:$8 sps:$4 sm:$0xff]   ;;  %v1627_v18 = vld [vmem:[#allocation2 + $0x120] ss:$8 sps:$4 sm:$0xff]   ;;  %v1612_v19 = vld [vmem:[#allocation2 + $0x64] ss:$8 sps:$4 sm:$0xff]  }
  0x19   :  { %149 = vmatprep.subr.bf16.mxu0 %v1600_v5  ;;  %402 = vmatprep.subr.bf16.mxu1 %v1622_v12  ;;  %v1628_v20 = vld [vmem:[#allocation2 + $0x134] ss:$8 sps:$4 sm:$0xff]   ;;  %v1614_v21 = vld [vmem:[#allocation2 + $0x60] ss:$8 sps:$4 sm:$0xff]   ;;  %v1630_v22 = vld [vmem:[#allocation2 + $0x130] ss:$8 sps:$4 sm:$0xff]  }
  0x1a   :  { %v1615_v23 = vld [vmem:[#allocation2 + $0x74] ss:$8 sps:$4 sm:$0xff]   ;;  %v1631_v24 = vld [vmem:[#allocation2 + $0x144] ss:$8 sps:$4 sm:$0xff]   ;;  %v1617_v25 = vld [vmem:[#allocation2 + $0x70] ss:$8 sps:$4 sm:$0xff]  }
  0x1b   :  { %v1633_v26 = vld [vmem:[#allocation2 + $0x140] ss:$8 sps:$4 sm:$0xff]   ;;  %v1634_v28 = vld [vmem:[#allocation2 + $0x154] ss:$8 sps:$4 sm:$0xff]   ;;  %v1636_v29 = vld [vmem:[#allocation2 + $0x150] ss:$8 sps:$4 sm:$0xff]  }
  0x1c   :  { %150 = vmatpush1.bf16.msra.mxu0 %v1602_v6  ;;  %403 = vmatpush1.bf16.msra.mxu1 %v1624_v14  ;;  %v1618_v27 = vld [vmem:[%s1932_s0] sm:$0xff]   ;;  %v1640_v32 = vld [vmem:[#allocation2 + $0x174] ss:$8 sps:$4 sm:$0xff]   ;;  %v1642_v33 = vld [vmem:[#allocation2 + $0x170] ss:$8 sps:$4 sm:$0xff]   ;;  %v49_v14 = vlaneseq }
  0x1d   :  { %151 = vmatprep.subr.bf16.mxu0 %v1603_v7  ;;  %404 = vmatprep.subr.bf16.mxu1 %v1625_v16  ;;  %v1637_v30 = vld [vmem:[#allocation2 + $0x164] ss:$8 sps:$4 sm:$0xff]   ;;  %v1639_v31 = vld [vmem:[#allocation2 + $0x160] ss:$8 sps:$4 sm:$0xff]   ;;  %v1646_v36 = vld [vmem:[#allocation2 + $0x194] ss:$8 sps:$4 sm:$0xff]  }
  0x1e   :  { %v1643_v34 = vld [vmem:[#allocation2 + $0x184] ss:$8 sps:$4 sm:$0xff]   ;;  %v1645_v35 = vld [vmem:[#allocation2 + $0x180] ss:$8 sps:$4 sm:$0xff]   ;;  %v1648_v37 = vld [vmem:[#allocation2 + $0x190] ss:$8 sps:$4 sm:$0xff]  }
  0x1f   :  { %v1649_v38 = vld [vmem:[#allocation2 + $0x1a4] ss:$8 sps:$4 sm:$0xff]   ;;  %v1651_v39 = vld [vmem:[#allocation2 + $0x1a0] ss:$8 sps:$4 sm:$0xff]   ;;  %v1652_v40 = vld [vmem:[#allocation2 + $0x1b4] ss:$8 sps:$4 sm:$0xff]  }
  0x20   :  { %152 = vmatpush1.bf16.msra.mxu0 %v1605_v8  ;;  %405 = vmatpush1.bf16.msra.mxu1 %v1627_v18  ;;  %v1654_v41 = vld [vmem:[#allocation2 + $0x1b0] ss:$8 sps:$4 sm:$0xff]   ;;  %v1655_v42 = vld [vmem:[#allocation2 + $0x1c4] ss:$8 sps:$4 sm:$0xff]   ;;  %v1657_v43 = vld [vmem:[#allocation2 + $0x1c0] ss:$8 sps:$4 sm:$0xff]  }
  0x21   :  { %153 = vmatprep.subr.bf16.mxu0 %v1606_v9  ;;  %406 = vmatprep.subr.bf16.mxu1 %v1628_v20  ;;  %v1658_v44 = vld [vmem:[#allocation2 + $0x1d4] ss:$8 sps:$4 sm:$0xff]   ;;  %v1660_v45 = vld [vmem:[#allocation2 + $0x1d0] ss:$8 sps:$4 sm:$0xff]   ;;  %v1661_v46 = vld [vmem:[#allocation2 + $0x1e4] ss:$8 sps:$4 sm:$0xff]  }
  0x22   :  { %v1663_v47 = vld [vmem:[#allocation2 + $0x1e0] ss:$8 sps:$4 sm:$0xff]   ;;  %v1664_v48 = vld [vmem:[#allocation2 + $0x1f4] ss:$8 sps:$4 sm:$0xff]   ;;  %v1666_v49 = vld [vmem:[#allocation2 + $0x1f0] ss:$8 sps:$4 sm:$0xff]  }
  0x23   :  { %v1667_v50 = vld [vmem:[#allocation2 + $0x200] ss:$8 sps:$4 sm:$0xff]   ;;  %v1669_v51 = vld [vmem:[#allocation2 + $0x204] ss:$8 sps:$4 sm:$0xff]   ;;  %v1672_v52 = vld [vmem:[#allocation2 + $0x214] ss:$8 sps:$4 sm:$0xff]  }
  0x24   :  { %154 = vmatpush1.bf16.msra.mxu0 %v1608_v13  ;;  %407 = vmatpush1.bf16.msra.mxu1 %v1630_v22  ;;  %v1670_v53 = vld [vmem:[#allocation2 + $0x210] ss:$8 sps:$4 sm:$0xff]   ;;  %v1675_v54 = vld [vmem:[#allocation2 + $0x224] ss:$8 sps:$4 sm:$0xff]   ;;  %v1673_v55 = vld [vmem:[#allocation2 + $0x220] ss:$8 sps:$4 sm:$0xff]  }
  0x25   :  { %155 = vmatprep.subr.bf16.mxu0 %v1609_v15  ;;  %408 = vmatprep.subr.bf16.mxu1 %v1631_v24  ;;  %v1678_v56 = vld [vmem:[#allocation2 + $0x234] ss:$8 sps:$4 sm:$0xff]   ;;  %v1676_v57 = vld [vmem:[#allocation2 + $0x230] ss:$8 sps:$4 sm:$0xff]   ;;  %v1681_v58 = vld [vmem:[#allocation2 + $0x244] ss:$8 sps:$4 sm:$0xff]  }
  0x26   :  { %v1679_v59 = vld [vmem:[#allocation2 + $0x240] ss:$8 sps:$4 sm:$0xff]   ;;  %v1684_v60 = vld [vmem:[#allocation2 + $0x254] ss:$8 sps:$4 sm:$0xff]   ;;  %v1682_v61 = vld [vmem:[#allocation2 + $0x250] ss:$8 sps:$4 sm:$0xff]  }
  0x27   :  { %v1687_v62 = vld [vmem:[#allocation2 + $0x264] ss:$8 sps:$4 sm:$0xff]   ;;  %v1685_v63 = vld [vmem:[#allocation2 + $0x260] ss:$8 sps:$4 sm:$0xff]   ;;  %v1690_v0 = vld [vmem:[#allocation2 + $0x274] ss:$8 sps:$4 sm:$0xff]  }
  0x28   :  { %156 = vmatpush1.bf16.msra.mxu0 %v1611_v17  ;;  %409 = vmatpush1.bf16.msra.mxu1 %v1633_v26  ;;  %v1688_v1 = vld [vmem:[#allocation2 + $0x270] ss:$8 sps:$4 sm:$0xff]   ;;  %v1693_v2 = vld [vmem:[#allocation2 + $0x284] ss:$8 sps:$4 sm:$0xff]   ;;  %v1691_v3 = vld [vmem:[#allocation2 + $0x280] ss:$8 sps:$4 sm:$0xff]  }
  0x29   :  { %157 = vmatprep.subr.bf16.mxu0 %v1612_v19  ;;  %410 = vmatprep.subr.bf16.mxu1 %v1634_v28  ;;  %v1696_v4 = vld [vmem:[#allocation2 + $0x294] ss:$8 sps:$4 sm:$0xff]   ;;  %v1694_v5 = vld [vmem:[#allocation2 + $0x290] ss:$8 sps:$4 sm:$0xff]   ;;  %v1699_v6 = vld [vmem:[#allocation2 + $0x2a4] ss:$8 sps:$4 sm:$0xff]  }
  0x2a   :  { %v1697_v7 = vld [vmem:[#allocation2 + $0x2a0] ss:$8 sps:$4 sm:$0xff]   ;;  %v1702_v8 = vld [vmem:[#allocation2 + $0x2b4] ss:$8 sps:$4 sm:$0xff]   ;;  %v1700_v9 = vld [vmem:[#allocation2 + $0x2b0] ss:$8 sps:$4 sm:$0xff]  }
  0x2b   :  { %v1705_v10 = vld [vmem:[#allocation2 + $0x2c4] ss:$8 sps:$4 sm:$0xff]   ;;  %v1703_v11 = vld [vmem:[#allocation2 + $0x2c0] ss:$8 sps:$4 sm:$0xff]   ;;  %v1708_v12 = vld [vmem:[#allocation2 + $0x2d4] ss:$8 sps:$4 sm:$0xff]  }
  0x2c   :  { %158 = vmatpush1.bf16.msra.mxu0 %v1614_v21  ;;  %411 = vmatpush1.bf16.msra.mxu1 %v1636_v29  ;;  %v1706_v13 = vld [vmem:[#allocation2 + $0x2d0] ss:$8 sps:$4 sm:$0xff]   ;;  %v50_v15 = vshrl.u32 %v49_v14, 7  ;;  %v47_v17 = vld [vmem:[%s1934_s2] sm:$0x3] }
  0x2d   :  { %159 = vmatprep.subr.bf16.mxu0 %v1615_v23  ;;  %412 = vmatprep.subr.bf16.mxu1 %v1637_v30 }
  0x2e   :  { %v1894_v16 = vsub.s32 0, %v50_v15  ;;  %v1899_v18 = vsub.s32 1, %v50_v15 }
  0x30   :  { %160 = vmatpush1.bf16.msra.mxu0 %v1617_v25  ;;  %413 = vmatpush1.bf16.msra.mxu1 %v1639_v31  ;;  %v52_v19 = vrot.slane %v47_v17, %v1894_v16  ;;  %v56_v20 = vrot.slane %v47_v17, %v1899_v18 }
  0x31   :  { %414 = vmatprep.subr.bf16.mxu1 %v1640_v32  ;;  %655 = vmatprep.subr.bf16.mxu0 %v1669_v51  ;;  %v1735_v51 = vld [vmem:[#allocation2 + $0x364] ss:$8 sps:$4 sm:$0xff]  }
  0x33   :  { %178 = vmatmul.mubr.bf16.vlgmr.msra.gmra.mrb[0].mxu0 %v1618_v27 }
  0x34   :  { %415 = vmatpush1.bf16.msra.mxu1 %v1642_v33  ;;  %656 = vmatpush1.bf16.msra.mxu0 %v1667_v50  ;;  %v1730_v50 = vld [vmem:[#allocation2 + $0x350] ss:$8 sps:$4 sm:$0xff]  }
  0x35   :  { %416 = vmatprep.subr.bf16.mxu1 %v1643_v34  ;;  %657 = vmatprep.subr.bf16.mxu0 %v1672_v52  ;;  %v1733_v52 = vld [vmem:[#allocation2 + $0x360] ss:$8 sps:$4 sm:$0xff]  }
  0x38   :  { %417 = vmatpush1.bf16.msra.mxu1 %v1645_v35  ;;  %658 = vmatpush1.bf16.msra.mxu0 %v1670_v53  ;;  %v1711_v35 = vld [vmem:[#allocation2 + $0x2e4] ss:$8 sps:$4 sm:$0xff]   ;;  %v1738_v53 = vld [vmem:[#allocation2 + $0x374] ss:$8 sps:$4 sm:$0xff]  }
  0x39   :  { %418 = vmatprep.subr.bf16.mxu1 %v1646_v36  ;;  %659 = vmatprep.subr.bf16.mxu0 %v1675_v54  ;;  %v1709_v36 = vld [vmem:[#allocation2 + $0x2e0] ss:$8 sps:$4 sm:$0xff]   ;;  %v1736_v54 = vld [vmem:[#allocation2 + $0x370] ss:$8 sps:$4 sm:$0xff]  }
  0x3c   :  { %419 = vmatpush1.bf16.msra.mxu1 %v1648_v37  ;;  %660 = vmatpush1.bf16.msra.mxu0 %v1673_v55  ;;  %v1714_v37 = vld [vmem:[#allocation2 + $0x2f4] ss:$8 sps:$4 sm:$0xff]   ;;  %v1741_v55 = vld [vmem:[#allocation2 + $0x384] ss:$8 sps:$4 sm:$0xff]  }
  0x3d   :  { %420 = vmatprep.subr.bf16.mxu1 %v1649_v38  ;;  %661 = vmatprep.subr.bf16.mxu0 %v1678_v56  ;;  %v1712_v38 = vld [vmem:[#allocation2 + $0x2f0] ss:$8 sps:$4 sm:$0xff]   ;;  %v1739_v56 = vld [vmem:[#allocation2 + $0x380] ss:$8 sps:$4 sm:$0xff]  }
  0x40   :  { %421 = vmatpush1.bf16.msra.mxu1 %v1651_v39  ;;  %662 = vmatpush1.bf16.msra.mxu0 %v1676_v57  ;;  %v1715_v39 = vld [vmem:[#allocation2 + $0x300] ss:$8 sps:$4 sm:$0xff]   ;;  %v1744_v57 = vld [vmem:[#allocation2 + $0x394] ss:$8 sps:$4 sm:$0xff]  }
  0x41   :  { %422 = vmatprep.subr.bf16.mxu1 %v1652_v40  ;;  %663 = vmatprep.subr.bf16.mxu0 %v1681_v58  ;;  %v1717_v40 = vld [vmem:[#allocation2 + $0x304] ss:$8 sps:$4 sm:$0xff]   ;;  %v1742_v58 = vld [vmem:[#allocation2 + $0x390] ss:$8 sps:$4 sm:$0xff]  }
  0x44   :  { %423 = vmatpush1.bf16.msra.mxu1 %v1654_v41  ;;  %664 = vmatpush1.bf16.msra.mxu0 %v1679_v59  ;;  %v1720_v41 = vld [vmem:[#allocation2 + $0x314] ss:$8 sps:$4 sm:$0xff]   ;;  %v1747_v59 = vld [vmem:[#allocation2 + $0x3a4] ss:$8 sps:$4 sm:$0xff]  }
  0x45   :  { %424 = vmatprep.subr.bf16.mxu1 %v1655_v42  ;;  %665 = vmatprep.subr.bf16.mxu0 %v1684_v60  ;;  %v1718_v42 = vld [vmem:[#allocation2 + $0x310] ss:$8 sps:$4 sm:$0xff]   ;;  %v1745_v60 = vld [vmem:[#allocation2 + $0x3a0] ss:$8 sps:$4 sm:$0xff]  }
  0x48   :  { %425 = vmatpush1.bf16.msra.mxu1 %v1657_v43  ;;  %666 = vmatpush1.bf16.msra.mxu0 %v1682_v61  ;;  %v1723_v43 = vld [vmem:[#allocation2 + $0x324] ss:$8 sps:$4 sm:$0xff]   ;;  %v1750_v61 = vld [vmem:[#allocation2 + $0x3b4] ss:$8 sps:$4 sm:$0xff]  }
  0x49   :  { %426 = vmatprep.subr.bf16.mxu1 %v1658_v44  ;;  %667 = vmatprep.subr.bf16.mxu0 %v1687_v62  ;;  %v1721_v44 = vld [vmem:[#allocation2 + $0x320] ss:$8 sps:$4 sm:$0xff]   ;;  %v1748_v62 = vld [vmem:[#allocation2 + $0x3b0] ss:$8 sps:$4 sm:$0xff]  }
  0x4c   :  { %427 = vmatpush1.bf16.msra.mxu1 %v1660_v45  ;;  %668 = vmatpush1.bf16.msra.mxu0 %v1685_v63  ;;  %v1726_v45 = vld [vmem:[#allocation2 + $0x334] ss:$8 sps:$4 sm:$0xff]   ;;  %v1753_v63 = vld [vmem:[#allocation2 + $0x3c4] ss:$8 sps:$4 sm:$0xff]  }
  0x4d   :  { %428 = vmatprep.subr.bf16.mxu1 %v1661_v46  ;;  %669 = vmatprep.subr.bf16.mxu0 %v1690_v0  ;;  %v1724_v46 = vld [vmem:[#allocation2 + $0x330] ss:$8 sps:$4 sm:$0xff]   ;;  %v1751_v0 = vld [vmem:[#allocation2 + $0x3c0] ss:$8 sps:$4 sm:$0xff]  }
  0x50   :  { %429 = vmatpush1.bf16.msra.mxu1 %v1663_v47  ;;  %670 = vmatpush1.bf16.msra.mxu0 %v1688_v1  ;;  %v1729_v47 = vld [vmem:[#allocation2 + $0x344] ss:$8 sps:$4 sm:$0xff]   ;;  %v1756_v1 = vld [vmem:[#allocation2 + $0x3d4] ss:$8 sps:$4 sm:$0xff]  }
  0x51   :  { %430 = vmatprep.subr.bf16.mxu1 %v1664_v48  ;;  %671 = vmatprep.subr.bf16.mxu0 %v1693_v2  ;;  %v1727_v48 = vld [vmem:[#allocation2 + $0x340] ss:$8 sps:$4 sm:$0xff]   ;;  %v1754_v2 = vld [vmem:[#allocation2 + $0x3d0] ss:$8 sps:$4 sm:$0xff]  }
  0x54   :  { %431 = vmatpush1.bf16.msra.mxu1 %v1666_v49  ;;  %672 = vmatpush1.bf16.msra.mxu0 %v1691_v3  ;;  %v1732_v49 = vld [vmem:[#allocation2 + $0x354] ss:$8 sps:$4 sm:$0xff]   ;;  %v1418_v3 = vld [vmem:[%s1934_s2 + $0x2] sm:$0x3] }
  0x55   :  { %673 = vmatprep.subr.bf16.mxu0 %v1696_v4  ;;  %910 = vmatprep.subr.bf16.mxu1 %v1717_v40  ;;  %v233_v4 = vrot.slane %v1418_v3, %v1894_v16  ;;  %v1786_v40 = vld [vmem:[#allocation2 + $0x474] ss:$8 sps:$4 sm:$0xff]  }
  0x58   :  { %674 = vmatpush1.bf16.msra.mxu0 %v1694_v5  ;;  %v237_v5 = vrot.slane %v1418_v3, %v1899_v18 }
  0x59   :  { %675 = vmatprep.subr.bf16.mxu0 %v1699_v6 }
  0x5c   :  { %676 = vmatpush1.bf16.msra.mxu0 %v1697_v7 }
  0x5d   :  { %677 = vmatprep.subr.bf16.mxu0 %v1702_v8 }
  0x60   :  { %678 = vmatpush1.bf16.msra.mxu0 %v1700_v9 }
  0x61   :  { %679 = vmatprep.subr.bf16.mxu0 %v1705_v10 }
  0x64   :  { %680 = vmatpush1.bf16.msra.mxu0 %v1703_v11 }
  0x65   :  { %681 = vmatprep.subr.bf16.mxu0 %v1708_v12 }
  0x68   :  { %682 = vmatpush1.bf16.msra.mxu0 %v1706_v13 }
  0x69   :  { %683 = vmatprep.subr.bf16.mxu0 %v1711_v35  ;;  %v1775_v35 = vld [vmem:[#allocation2 + $0x440] ss:$8 sps:$4 sm:$0xff]  }
  0x6c   :  { %684 = vmatpush1.bf16.msra.mxu0 %v1709_v36  ;;  %v1780_v36 = vld [vmem:[#allocation2 + $0x454] ss:$8 sps:$4 sm:$0xff]  }
  0x6d   :  { %685 = vmatprep.subr.bf16.mxu0 %v1714_v37  ;;  %v1778_v37 = vld [vmem:[#allocation2 + $0x450] ss:$8 sps:$4 sm:$0xff]  }
  0x70   :  { %686 = vmatpush1.bf16.msra.mxu0 %v1712_v38  ;;  %v1783_v38 = vld [vmem:[#allocation2 + $0x464] ss:$8 sps:$4 sm:$0xff]  }
 0x106   :  { %v179_v21 = vpop.f32.mrb[0].mxu0 }
 0x107   :  { %v180_v22 = vadd.f32 %v179_v21, %v52_v19  ;;  %v181_v23 = vpop.f32.mrb[1].mxu0 }
 0x108   :  { %v182_v24 = vadd.f32 %v181_v23, %v56_v20  ;;  %v183_v25 = vpop.f32.mrb[2].mxu0  ;;  %v1757_v23 = vld [vmem:[#allocation2 + $0x3e0] ss:$8 sps:$4 sm:$0xff]  }
 0x109   :  { %v184_v26 = vadd.f32 %v183_v25, %v52_v19  ;;  %v185_v27 = vpop.f32.mrb[3].mxu0  ;;  %v188_v29 = vmax.f32 %v180_v22, 0.0  ;;  %v1759_v22 = vld [vmem:[#allocation2 + $0x3e4] ss:$8 sps:$4 sm:$0xff]   ;;  %v1760_v25 = vld [vmem:[#allocation2 + $0x3f0] ss:$8 sps:$4 sm:$0xff]  }
 0x10a   :  { %v186_v28 = vadd.f32 %v185_v27, %v56_v20  ;;  %v189_v31 = vmax.f32 %v182_v24, 0.0  ;;  %v1762_v24 = vld [vmem:[#allocation2 + $0x3f4] ss:$8 sps:$4 sm:$0xff]   ;;  %v1765_v27 = vld [vmem:[#allocation2 + $0x404] ss:$8 sps:$4 sm:$0xff]  }
 0x10b   :  { %v190_v30 = vmax.f32 %v184_v26, 0.0  ;;  %v1763_v26 = vld [vmem:[#allocation2 + $0x400] ss:$8 sps:$4 sm:$0xff]   ;;  %1165 = vmatprep.subr.bf16.mxu0 %v1765_v27 }
 0x10c   :  { %v191_v32 = vmax.f32 %v186_v28, 0.0  ;;  %v1768_v28 = vld [vmem:[#allocation2 + $0x414] ss:$8 sps:$4 sm:$0xff]  }
 0x10d   :  { %v192_v33 = vpack.c.bf16 %v190_v30, %v188_v29  ;;  %v1766_v29 = vld [vmem:[#allocation2 + $0x410] ss:$8 sps:$4 sm:$0xff]   ;;  %v1771_v30 = vld [vmem:[#allocation2 + $0x424] ss:$8 sps:$4 sm:$0xff]  }
 0x10e   :  { %v193_v34 = vpack.c.bf16 %v191_v32, %v189_v31  ;;  %v1769_v31 = vld [vmem:[#allocation2 + $0x420] ss:$8 sps:$4 sm:$0xff]   ;;  %v1774_v32 = vld [vmem:[#allocation2 + $0x434] ss:$8 sps:$4 sm:$0xff]  }
 0x110   :  { %432 = vmatprep.mubr.bf16.mxu1 %v193_v34  ;;  %v1777_v34 = vld [vmem:[#allocation2 + $0x444] ss:$8 sps:$4 sm:$0xff]  }
 0x111   :  { %433 = vmatmul.mubr.bf16.vlgmr.msra.gmra.mrb[0].mxu1 %v192_v33  ;;  %v1772_v33 = vld [vmem:[#allocation2 + $0x430] ss:$8 sps:$4 sm:$0xff]  }
 0x112   :  { %911 = vmatpush1.bf16.msra.mxu1 %v1715_v39  ;;  %v1781_v39 = vld [vmem:[#allocation2 + $0x460] ss:$8 sps:$4 sm:$0xff]  }
 0x113   :  { %912 = vmatprep.subr.bf16.mxu1 %v1720_v41  ;;  %v1784_v41 = vld [vmem:[#allocation2 + $0x470] ss:$8 sps:$4 sm:$0xff]  }
 0x116   :  { %913 = vmatpush1.bf16.msra.mxu1 %v1718_v42  ;;  %v1789_v42 = vld [vmem:[#allocation2 + $0x484] ss:$8 sps:$4 sm:$0xff]  }
 0x117   :  { %914 = vmatprep.subr.bf16.mxu1 %v1723_v43  ;;  %v1787_v43 = vld [vmem:[#allocation2 + $0x480] ss:$8 sps:$4 sm:$0xff]  }
 0x11a   :  { %915 = vmatpush1.bf16.msra.mxu1 %v1721_v44  ;;  %v1792_v44 = vld [vmem:[#allocation2 + $0x494] ss:$8 sps:$4 sm:$0xff]  }
 0x11b   :  { %916 = vmatprep.subr.bf16.mxu1 %v1726_v45  ;;  %v1790_v45 = vld [vmem:[#allocation2 + $0x490] ss:$8 sps:$4 sm:$0xff]  }
 0x11e   :  { %917 = vmatpush1.bf16.msra.mxu1 %v1724_v46  ;;  %v1795_v46 = vld [vmem:[#allocation2 + $0x4a4] ss:$8 sps:$4 sm:$0xff]  }
 0x11f   :  { %918 = vmatprep.subr.bf16.mxu1 %v1729_v47  ;;  %v1793_v47 = vld [vmem:[#allocation2 + $0x4a0] ss:$8 sps:$4 sm:$0xff]  }
 0x122   :  { %919 = vmatpush1.bf16.msra.mxu1 %v1727_v48  ;;  %v1798_v48 = vld [vmem:[#allocation2 + $0x4b4] ss:$8 sps:$4 sm:$0xff]  }
 0x123   :  { %920 = vmatprep.subr.bf16.mxu1 %v1732_v49  ;;  %v1796_v49 = vld [vmem:[#allocation2 + $0x4b0] ss:$8 sps:$4 sm:$0xff]  }
 0x126   :  { %921 = vmatpush1.bf16.msra.mxu1 %v1730_v50  ;;  %v1801_v50 = vld [vmem:[#allocation2 + $0x4c4] ss:$8 sps:$4 sm:$0xff]  }
 0x127   :  { %922 = vmatprep.subr.bf16.mxu1 %v1735_v51  ;;  %v1799_v51 = vld [vmem:[#allocation2 + $0x4c0] ss:$8 sps:$4 sm:$0xff]  }
 0x12a   :  { %923 = vmatpush1.bf16.msra.mxu1 %v1733_v52  ;;  %v1804_v52 = vld [vmem:[#allocation2 + $0x4d4] ss:$8 sps:$4 sm:$0xff]  }
 0x12b   :  { %924 = vmatprep.subr.bf16.mxu1 %v1738_v53  ;;  %v1802_v53 = vld [vmem:[#allocation2 + $0x4d0] ss:$8 sps:$4 sm:$0xff]  }
 0x12e   :  { %925 = vmatpush1.bf16.msra.mxu1 %v1736_v54  ;;  %v1451_v54 = vld [vmem:[%s1934_s2 + $0x4] sm:$0x3] }
 0x12f   :  { %926 = vmatprep.subr.bf16.mxu1 %v1741_v55  ;;  %v488_v55 = vrot.slane %v1451_v54, %v1894_v16 }
 0x132   :  { %927 = vmatpush1.bf16.msra.mxu1 %v1739_v56  ;;  %v492_v56 = vrot.slane %v1451_v54, %v1899_v18 }
 0x133   :  { %928 = vmatprep.subr.bf16.mxu1 %v1744_v57 }
 0x136   :  { %929 = vmatpush1.bf16.msra.mxu1 %v1742_v58 }
 0x137   :  { %930 = vmatprep.subr.bf16.mxu1 %v1747_v59 }
 0x13a   :  { %931 = vmatpush1.bf16.msra.mxu1 %v1745_v60 }
 0x13b   :  { %932 = vmatprep.subr.bf16.mxu1 %v1750_v61 }
 0x13e   :  { %933 = vmatpush1.bf16.msra.mxu1 %v1748_v62 }
 0x13f   :  { %934 = vmatprep.subr.bf16.mxu1 %v1753_v63 }
 0x142   :  { %935 = vmatpush1.bf16.msra.mxu1 %v1751_v0 }
 0x143   :  { %936 = vmatprep.subr.bf16.mxu1 %v1756_v1 }
 0x146   :  { %937 = vmatpush1.bf16.msra.mxu1 %v1754_v2 }
 0x147   :  { %938 = vmatprep.subr.bf16.mxu1 %v1759_v22  ;;  %v1820_v22 = vld [vmem:[#allocation2 + $0x540] ss:$8 sps:$4 sm:$0xff]  }
 0x14a   :  { %939 = vmatpush1.bf16.msra.mxu1 %v1757_v23  ;;  %v1821_v23 = vld [vmem:[#allocation2 + $0x5d0] ss:$8 sps:$4 sm:$0xff]  }
 0x14b   :  { %940 = vmatprep.subr.bf16.mxu1 %v1762_v24  ;;  %v1484_v24 = vld [vmem:[%s1934_s2 + $0x6] sm:$0x3] }
 0x14e   :  { %941 = vmatpush1.bf16.msra.mxu1 %v1760_v25  ;;  %v743_v25 = vrot.slane %v1484_v24, %v1894_v16 }
 0x1e4   :  { %v434_v6 = vpop.f32.mrb[0].mxu1 }
 0x1e5   :  { %v435_v7 = vadd.f32 %v434_v6, %v233_v4  ;;  %v436_v8 = vpop.f32.mrb[1].mxu1 }
 0x1e6   :  { %v437_v9 = vadd.f32 %v436_v8, %v237_v5  ;;  %v438_v10 = vpop.f32.mrb[2].mxu1  ;;  %v1805_v8 = vld [vmem:[#allocation2 + $0x4e0] ss:$8 sps:$4 sm:$0xff]  }
 0x1e7   :  { %v439_v11 = vadd.f32 %v438_v10, %v233_v4  ;;  %v440_v12 = vpop.f32.mrb[3].mxu1  ;;  %v443_v14 = vmax.f32 %v435_v7, 0.0  ;;  %v1807_v7 = vld [vmem:[#allocation2 + $0x4e4] ss:$8 sps:$4 sm:$0xff]   ;;  %v1808_v10 = vld [vmem:[#allocation2 + $0x4f0] ss:$8 sps:$4 sm:$0xff]  }
 0x1e8   :  { %v441_v13 = vadd.f32 %v440_v12, %v237_v5  ;;  %v444_v17 = vmax.f32 %v437_v9, 0.0  ;;  %v1810_v9 = vld [vmem:[#allocation2 + $0x4f4] ss:$8 sps:$4 sm:$0xff]   ;;  %v1812_v12 = vld [vmem:[#allocation2 + $0x500] ss:$8 sps:$4 sm:$0xff]  }
 0x1e9   :  { %v445_v15 = vmax.f32 %v439_v11, 0.0  ;;  %v1811_v11 = vld [vmem:[#allocation2 + $0x580] ss:$8 sps:$4 sm:$0xff]  }
 0x1ea   :  { %v446_v19 = vmax.f32 %v441_v13, 0.0  ;;  %v1813_v13 = vld [vmem:[#allocation2 + $0x590] ss:$8 sps:$4 sm:$0xff]   ;;  %1568 = vmatprep.subr.bf16.mxu1 %v1811_v11 }
 0x1eb   :  { %v447_v20 = vpack.c.bf16 %v445_v15, %v443_v14  ;;  %v1814_v14 = vld [vmem:[#allocation2 + $0x510] ss:$8 sps:$4 sm:$0xff]   ;;  %v1815_v15 = vld [vmem:[#allocation2 + $0x5a0] ss:$8 sps:$4 sm:$0xff]  }
 0x1ec   :  { %v448_v21 = vpack.c.bf16 %v446_v19, %v444_v17  ;;  %v1816_v17 = vld [vmem:[#allocation2 + $0x520] ss:$8 sps:$4 sm:$0xff]   ;;  %v1817_v19 = vld [vmem:[#allocation2 + $0x5b0] ss:$8 sps:$4 sm:$0xff]  }
 0x1ee   :  { %687 = vmatprep.mubr.bf16.mxu0 %v448_v21  ;;  %v1819_v21 = vld [vmem:[#allocation2 + $0x5c0] ss:$8 sps:$4 sm:$0xff]  }
 0x1ef   :  { %688 = vmatmul.mubr.bf16.vlgmr.msra.gmra.mrb[4].mxu0 %v447_v20  ;;  %v1818_v20 = vld [vmem:[#allocation2 + $0x530] ss:$8 sps:$4 sm:$0xff]  }
 0x1f0   :  { %1166 = vmatpush1.bf16.msra.mxu0 %v1763_v26  ;;  %v747_v26 = vrot.slane %v1484_v24, %v1899_v18 }
 0x1f1   :  { %1167 = vmatprep.subr.bf16.mxu0 %v1768_v28 }
 0x1f4   :  { %1168 = vmatpush1.bf16.msra.mxu0 %v1766_v29 }
 0x1f5   :  { %1169 = vmatprep.subr.bf16.mxu0 %v1771_v30 }
 0x1f8   :  { %1170 = vmatpush1.bf16.msra.mxu0 %v1769_v31 }
 0x1f9   :  { %1171 = vmatprep.subr.bf16.mxu0 %v1774_v32 }
 0x1fc   :  { %1172 = vmatpush1.bf16.msra.mxu0 %v1772_v33 }
 0x1fd   :  { %1173 = vmatprep.subr.bf16.mxu0 %v1777_v34 }
 0x200   :  { %1174 = vmatpush1.bf16.msra.mxu0 %v1775_v35 }
 0x201   :  { %1175 = vmatprep.subr.bf16.mxu0 %v1780_v36 }
 0x204   :  { %1176 = vmatpush1.bf16.msra.mxu0 %v1778_v37 }
 0x205   :  { %1177 = vmatprep.subr.bf16.mxu0 %v1783_v38 }
 0x208   :  { %1178 = vmatpush1.bf16.msra.mxu0 %v1781_v39 }
 0x209   :  { %1179 = vmatprep.subr.bf16.mxu0 %v1786_v40 }
 0x20c   :  { %1180 = vmatpush1.bf16.msra.mxu0 %v1784_v41  ;;  %v1822_v41 = vld [vmem:[#allocation2 + $0x550] ss:$8 sps:$4 sm:$0xff]  }
 0x20d   :  { %1181 = vmatprep.subr.bf16.mxu0 %v1789_v42  ;;  %v1823_v42 = vld [vmem:[#allocation2 + $0x5e0] ss:$8 sps:$4 sm:$0xff]  }
 0x210   :  { %1182 = vmatpush1.bf16.msra.mxu0 %v1787_v43  ;;  %v1824_v43 = vld [vmem:[#allocation2 + $0x560] ss:$8 sps:$4 sm:$0xff]  }
 0x211   :  { %1183 = vmatprep.subr.bf16.mxu0 %v1792_v44  ;;  %v1825_v44 = vld [vmem:[#allocation2 + $0x5f0] ss:$8 sps:$4 sm:$0xff]  }
 0x214   :  { %1184 = vmatpush1.bf16.msra.mxu0 %v1790_v45  ;;  %v1826_v45 = vld [vmem:[#allocation2 + $0x570] ss:$8 sps:$4 sm:$0xff]  }
 0x215   :  { %1185 = vmatprep.subr.bf16.mxu0 %v1795_v46  ;;  %v1517_v46 = vld [vmem:[%s1934_s2 + $0x8] sm:$0x3] }
 0x218   :  { %1186 = vmatpush1.bf16.msra.mxu0 %v1793_v47  ;;  %v998_v47 = vrot.slane %v1517_v46, %v1894_v16  ;;  %v1551_v16 = vld [vmem:[%s1934_s2 + $0xa] ss:$0 sm:$0xff] }
 0x219   :  { %1187 = vmatprep.subr.bf16.mxu0 %v1798_v48  ;;  %v1002_v48 = vrot.slane %v1517_v46, %v1899_v18 }
 0x21c   :  { %1188 = vmatpush1.bf16.msra.mxu0 %v1796_v49 }
 0x21d   :  { %1189 = vmatprep.subr.bf16.mxu0 %v1801_v50 }
 0x220   :  { %1190 = vmatpush1.bf16.msra.mxu0 %v1799_v51 }
 0x221   :  { %1191 = vmatprep.subr.bf16.mxu0 %v1804_v52 }
 0x224   :  { %1192 = vmatpush1.bf16.msra.mxu0 %v1802_v53 }
 0x225   :  { %1193 = vmatprep.subr.bf16.mxu0 %v1807_v7 }
 0x228   :  { %1194 = vmatpush1.bf16.msra.mxu0 %v1805_v8 }
 0x229   :  { %1195 = vmatprep.subr.bf16.mxu0 %v1810_v9 }
 0x22c   :  { %1196 = vmatpush1.bf16.msra.mxu0 %v1808_v10 }
 0x2c2   :  { %v689_v57 = vpop.f32.mrb[4].mxu0 }
 0x2c3   :  { %v690_v58 = vadd.f32 %v689_v57, %v488_v55  ;;  %v691_v59 = vpop.f32.mrb[5].mxu0 }
 0x2c4   :  { %v692_v60 = vadd.f32 %v691_v59, %v492_v56  ;;  %v693_v61 = vpop.f32.mrb[6].mxu0 }
 0x2c5   :  { %v694_v62 = vadd.f32 %v693_v61, %v488_v55  ;;  %v695_v63 = vpop.f32.mrb[7].mxu0  ;;  %v698_v1 = vmax.f32 %v690_v58, 0.0 }
 0x2c6   :  { %v696_v0 = vadd.f32 %v695_v63, %v492_v56  ;;  %v699_v3 = vmax.f32 %v692_v60, 0.0 }
 0x2c7   :  { %v700_v2 = vmax.f32 %v694_v62, 0.0 }
 0x2c8   :  { %v701_v4 = vmax.f32 %v696_v0, 0.0 }
 0x2c9   :  { %v702_v5 = vpack.c.bf16 %v700_v2, %v698_v1 }
 0x2ca   :  { %v703_v6 = vpack.c.bf16 %v701_v4, %v699_v3 }
 0x2cc   :  { %942 = vmatprep.mubr.bf16.mxu1 %v703_v6 }
 0x2cd   :  { %943 = vmatmul.mubr.bf16.vlgmr.msra.gmra.mrb[4].mxu1 %v702_v5 }
 0x2ce   :  { %1569 = vmatpush3.bf16.msra.mxu1 %v1812_v12 }
 0x2cf   :  { %1570 = vmatprep.subr.bf16.mxu1 %v1813_v13 }
 0x2d2   :  { %1571 = vmatpush3.bf16.msra.mxu1 %v1814_v14 }
 0x2d3   :  { %1572 = vmatprep.subr.bf16.mxu1 %v1815_v15 }
 0x2d6   :  { %1573 = vmatpush3.bf16.msra.mxu1 %v1816_v17 }
 0x2d7   :  { %1574 = vmatprep.subr.bf16.mxu1 %v1817_v19 }
 0x2da   :  { %1575 = vmatpush3.bf16.msra.mxu1 %v1818_v20 }
 0x2db   :  { %1576 = vmatprep.subr.bf16.mxu1 %v1819_v21 }
 0x2de   :  { %1577 = vmatpush3.bf16.msra.mxu1 %v1820_v22 }
 0x2df   :  { %1578 = vmatprep.subr.bf16.mxu1 %v1821_v23 }
 0x2e2   :  { %1579 = vmatpush3.bf16.msra.mxu1 %v1822_v41 }
 0x2e3   :  { %1580 = vmatprep.subr.bf16.mxu1 %v1823_v42 }
 0x2e6   :  { %1581 = vmatpush3.bf16.msra.mxu1 %v1824_v43 }
 0x2e7   :  { %1582 = vmatprep.subr.bf16.mxu1 %v1825_v44 }
 0x2ea   :  { %1583 = vmatpush3.bf16.msra.mxu1 %v1826_v45 }
 0x3a0   :  { %v944_v27 = vpop.f32.mrb[4].mxu1 }
 0x3a1   :  { %v945_v28 = vadd.f32 %v944_v27, %v743_v25  ;;  %v946_v29 = vpop.f32.mrb[5].mxu1 }
 0x3a2   :  { %v947_v30 = vadd.f32 %v946_v29, %v747_v26  ;;  %v948_v31 = vpop.f32.mrb[6].mxu1 }
 0x3a3   :  { %v949_v32 = vadd.f32 %v948_v31, %v743_v25  ;;  %v950_v33 = vpop.f32.mrb[7].mxu1  ;;  %v953_v35 = vmax.f32 %v945_v28, 0.0 }
 0x3a4   :  { %v951_v34 = vadd.f32 %v950_v33, %v747_v26  ;;  %v954_v37 = vmax.f32 %v947_v30, 0.0 }
 0x3a5   :  { %v955_v36 = vmax.f32 %v949_v32, 0.0 }
 0x3a6   :  { %v956_v38 = vmax.f32 %v951_v34, 0.0 }
 0x3a7   :  { %v957_v39 = vpack.c.bf16 %v955_v36, %v953_v35 }
 0x3a8   :  { %v958_v40 = vpack.c.bf16 %v956_v38, %v954_v37 }
 0x3aa   :  { %1197 = vmatprep.mubr.bf16.mxu0 %v958_v40 }
 0x3ab   :  { %1198 = vmatmul.mubr.bf16.vlgmr.msra.gmra.mrb[8].mxu0 %v957_v39 }
 0x47e   :  { %v1199_v49 = vpop.f32.mrb[8].mxu0 }
 0x47f   :  { %v1200_v50 = vadd.f32 %v1199_v49, %v998_v47  ;;  %v1201_v51 = vpop.f32.mrb[9].mxu0 }
 0x480   :  { %v1202_v52 = vadd.f32 %v1201_v51, %v1002_v48  ;;  %v1203_v53 = vpop.f32.mrb[10].mxu0 }
 0x481   :  { %v1204_v54 = vadd.f32 %v1203_v53, %v998_v47  ;;  %v1205_v55 = vpop.f32.mrb[11].mxu0  ;;  %v1208_v57 = vmax.f32 %v1200_v50, 0.0 }
 0x482   :  { %v1206_v56 = vadd.f32 %v1205_v55, %v1002_v48  ;;  %v1209_v59 = vmax.f32 %v1202_v52, 0.0 }
 0x483   :  { %v1210_v58 = vmax.f32 %v1204_v54, 0.0 }
 0x484   :  { %v1211_v60 = vmax.f32 %v1206_v56, 0.0 }
 0x485   :  { %v1212_v61 = vpack.c.bf16 %v1210_v58, %v1208_v57 }
 0x486   :  { %v1213_v62 = vpack.c.bf16 %v1211_v60, %v1209_v59 }
 0x488   :  { %1383 = vmatprep.mubr.bf16.mxu1 %v1213_v62 }
 0x489   :  { %1384 = vmatmul.mubr.bf16.vlgmr.msra.gmra.mrb[8].mxu1 %v1212_v61 }
 0x55c   :  { %v1584_v63 = vpop.f32.mrb[8].mxu1 }
 0x55d   :  { %v1585_v18 = vpop.f32.mrb[9].mxu1 }
 0x55e   :  { %v1586_v0 = vadd.f32 %v1585_v18, %v1584_v63  ;;  %v1587_v1 = vpop.f32.mrb[10].mxu1 }
 0x55f   :  { %v1588_v2 = vpop.f32.mrb[11].mxu1 }
 0x560   :  { %v1386_v3 = vadd.f32 %v1586_v0, %v1551_v16  ;;  %v1589_v4 = vadd.f32 %v1588_v2, %v1587_v1 }
 0x562   :  { %1827 = vtanh.f32 %v1386_v3  ;;  %v1389_v5 = vadd.f32 %v1589_v4, %v1551_v16 }
 0x564   :  { %1829 = vtanh.f32 %v1389_v5 }
 0x56c   :  { %v1828_v6 = vpop.eup %1827 }
 0x56d   :  { %1394 = vst [vmem:[%s1935_s3] sm:$0xff] %v1828_v6 }
 0x56e   :  { %v1830_v7 = vpop.eup %1829 }
 0x56f   :  { %1395 = vst [vmem:[%s1935_s3 + $0x8] sm:$0xff] %v1830_v7 }
 0x570   :  { %1400 = vsyncpa [#allocation3], 1 }

</bundles_post_ra>
